<compile_context>
chip_gen: v6e
topology: v6e:2x2x1
jax: 0.10.0
libtpu: 0.0.40
codegen_flags: <defaults>
</compile_context>

<pallas_src>
import jax
import jax.numpy as jnp
from jax.experimental import pallas as pl
from jax.experimental.pallas import tpu as pltpu


def linear_head_kernel(x_ref, wt_ref, bias_ref, o_ref):
    # x_ref:    (block_m, D)    streamed input rows (native dtype)
    # wt_ref:   (D, E_pad)      pre-transposed weight, resident across B tiles
    # bias_ref: (1, E_pad)      precomputed mean @ W^T (mean-subtract folded in)
    # o_ref:    (block_m, E_pad) L2-normalized embedding tile
    x = x_ref[...]
    w = wt_ref[...]
    if x.dtype != w.dtype:
        # Only cast when operand dtypes actually differ (module does x.float()
        # anyway); matched bf16/bf16 or f32/f32 goes straight to the MXU.
        x = x.astype(jnp.float32)
        w = w.astype(jnp.float32)

    # NN matmul on the MXU: (block_m, D) @ (D, E_pad) -> (block_m, E_pad), f32 acc.
    y = jax.lax.dot_general(
        x, w,
        dimension_numbers=(((1,), (0,)), ((), ())),
        preferred_element_type=jnp.float32,
    )
    # Folded mean-subtract: (x - m) @ W^T == x @ W^T - (m @ W^T).
    y = y - bias_ref[...]

    # F.normalize(y, p=2, dim=1): y / max(||y||_2, 1e-12)
    #   == y * rsqrt(max(sum(y*y), 1e-24));  rsqrt runs on the EUP slot.
    ss = jnp.sum(y * y, axis=1, keepdims=True)
    inv = jax.lax.rsqrt(jnp.maximum(ss, 1e-24))
    o_ref[...] = (y * inv).astype(o_ref.dtype)


def _round_up(n, m):
    return ((n + m - 1) // m) * m


def _vmem_capacity_bytes():
    try:
        return int(pltpu.get_tpu_info().vmem_capacity_bytes)
    except Exception:
        return 64 * 1024 * 1024  # conservative default: v7x per-TensorCore VMEM


def _pick_block_m(B, D, E_pad, x_bytes, w_bytes, o_bytes):
    """VMEM-aware row-tile picker.

    Keeps (resident single-buffered weight + bias) + (double-buffered x and out
    tiles) inside a conservative fraction of this generation's VMEM, and keeps
    the B grid >= 2 steps when possible so "parallel" semantics can shard the
    batch across v7x's two TensorCores.
    """
    vmem = _vmem_capacity_bytes()
    budget = int(vmem * 0.6)                          # headroom for compiler scratch
    resident = D * E_pad * w_bytes + 8 * E_pad * 4    # weight (1 copy) + bias
    per_row = 2 * D * x_bytes + 2 * E_pad * o_bytes   # double-buffered x + out
    avail = max(budget - resident, per_row * 8)
    max_rows = max((avail // per_row) // 8 * 8, 8)
    if B > 8:
        # Ensure at least 2 grid steps (megacore sharding on v7x).
        max_rows = min(max_rows, _round_up(pl.cdiv(B, 2), 8))
    block_m = min(512, max_rows)
    if block_m >= B:
        return B  # full-extent block is always layout-legal
    return max(8, (block_m // 8) * 8)


def _build_call(B, D, E_pad, block_m, x_bytes, w_bytes, o_bytes, out_dtype,
                single_buffer_resident):
    grid = (pl.cdiv(B, block_m),)
    w_copies = 1 if single_buffer_resident else 2

    def resident_spec(shape):
        idx_map = lambda i: (0,) * len(shape)
        if single_buffer_resident:
            return pl.BlockSpec(shape, idx_map, pipeline_mode=pl.Buffered(1))
        return pl.BlockSpec(shape, idx_map)

    # Explicit scoped-VMEM limit derived from the actual buffer sizes.
    footprint = (2 * block_m * D * x_bytes            # x, double-buffered
                 + 2 * block_m * E_pad * o_bytes      # out, double-buffered
                 + w_copies * D * E_pad * w_bytes     # resident weight
                 + w_copies * 8 * E_pad * 4)          # resident bias (sublane-padded)
    vmem_cap = _vmem_capacity_bytes()
    vmem_limit = int(min(max(footprint * 1.3 + (2 << 20), 32 << 20), vmem_cap))

    return pl.pallas_call(
        linear_head_kernel,
        out_shape=jax.ShapeDtypeStruct((B, E_pad), out_dtype),
        grid=grid,
        in_specs=[
            pl.BlockSpec((block_m, D), lambda i: (i, 0)),   # streamed x row tile
            resident_spec((D, E_pad)),                       # resident weight^T
            resident_spec((1, E_pad)),                       # resident bias
        ],
        out_specs=pl.BlockSpec((block_m, E_pad), lambda i: (i, 0)),
        compiler_params=pltpu.CompilerParams(
            dimension_semantics=("parallel",),
            vmem_limit_bytes=vmem_limit,
        ),
    )


def linear_head(x, mean, weight, *, block_m=None, out_dtype=jnp.float32):
    """LinearHead forward.

    x:      [B, D]  (f32 or bf16)
    mean:   [D]
    weight: [E, D]  PyTorch nn.Linear layout
    returns [B, E]  L2-normalized (dim=1) embeddings in `out_dtype`.
    """
    B, D = x.shape
    E, D_w = weight.shape
    assert D == D_w, "weight must be [embedding_size, final_layer_output_dim]"

    # Lane-dense output: pad E to a multiple of 128. Zero weight columns produce
    # zero outputs, so the per-row L2 norm is unchanged; slice back afterwards.
    E_pad = _round_up(E, 128)

    # One-time layout prep (off the hot loop):
    #   - transpose weight to [D, E_pad] -> plain NN matmul in the kernel,
    #   - fold the mean-subtract into a bias.
    # TODO(synk): in production, store the weight pre-transposed (and in bf16,
    # with bf16 x) so this transpose/cast never appears on the hot path and the
    # streamed DMA halves (full-rate bf16 MXU on all generations).
    weight_t = jnp.transpose(weight)                                   # [D, E]
    if E_pad != E:
        weight_t = jnp.pad(weight_t, ((0, 0), (0, E_pad - E)))
    bias = (mean.astype(jnp.float32)
            @ weight_t.astype(jnp.float32)).reshape(1, E_pad)

    x_bytes = jnp.dtype(x.dtype).itemsize
    w_bytes = jnp.dtype(weight_t.dtype).itemsize
    o_bytes = jnp.dtype(out_dtype).itemsize

    if block_m is None:
        block_m = _pick_block_m(B, D, E_pad, x_bytes, w_bytes, o_bytes)

    args = (B, D, E_pad, block_m, x_bytes, w_bytes, o_bytes, out_dtype)
    try:
        out = _build_call(*args, single_buffer_resident=True)(x, weight_t, bias)
    except Exception:
        # pipeline_mode=pl.Buffered(1) unsupported on this JAX/Mosaic build:
        # fall back to default double-buffering of the invariant operands.
        out = _build_call(*args, single_buffer_resident=False)(x, weight_t, bias)

    return out[:, :E] if E_pad != E else out


if __name__ == "__main__":
    # Small shapes consistent with the module:
    # batch=8, final_layer_output_dim=256, embedding_size=128.
    # (At this size the kernel is launch-bound; the tiling/VMEM logic above
    #  only pays off at production-scale B/D/E.)
    B, D, E = 8, 256, 128

    key = jax.random.PRNGKey(0)
    kx, km, kw = jax.random.split(key, 3)

    x = jax.random.normal(kx, (B, D), dtype=jnp.float32)
    mean = jax.random.normal(km, (D,), dtype=jnp.float32) * 0.1
    # Deterministic synthetic linear1 weight in PyTorch layout [E, D].
    weight = jax.random.normal(kw, (E, D), dtype=jnp.float32) * (1.0 / jnp.sqrt(D))

    out = jax.block_until_ready(linear_head(x, mean, weight))

    # Plain-JAX reference of the module's forward pass.
    y_ref = (x - mean[None, :]).astype(jnp.float32) @ weight.T
    n_ref = y_ref / jnp.maximum(
        jnp.sqrt(jnp.sum(y_ref * y_ref, axis=1, keepdims=True)), 1e-12
    )
    assert out.shape == (B, E)
    assert jnp.allclose(out, n_ref, atol=1e-5, rtol=1e-5), "mismatch vs reference"

    print("KERNEL_OK")
</pallas_src>

<mosaic_0001>
module attributes {stable_mosaic.version = 11 : i64} {
  func.func @linear_head_kernel(%arg0: i32, %arg1: memref<8x256xf32, #tpu.memory_space<vmem>>, %arg2: memref<256x128xf32, #tpu.memory_space<vmem>>, %arg3: memref<1x128xf32, #tpu.memory_space<vmem>>, %arg4: memref<8x128xf32, #tpu.memory_space<vmem>>) attributes {dimension_semantics = [#tpu.dimension_semantics<parallel>], iteration_bounds = array<i64: 1>, scalar_prefetch = 0 : i64, scratch_operands = 0 : i64, tpu.core_type = #tpu.core_type<tc>, window_params = [{transform_indices = @transform_0, window_bounds = array<i64: 8, 256>}, {pipeline_mode = #tpu.pipeline_mode<synchronous>, transform_indices = @transform_1, window_bounds = array<i64: 256, 128>}, {pipeline_mode = #tpu.pipeline_mode<synchronous>, transform_indices = @transform_2, window_bounds = array<i64: 1, 128>}, {transform_indices = @transform_3, window_bounds = array<i64: 8, 128>}]} {
    %c0 = arith.constant 0 : index
    %c0_0 = arith.constant 0 : index
    %0 = vector.load %arg1[%c0, %c0_0] : memref<8x256xf32, #tpu.memory_space<vmem>>, vector<8x256xf32>
    %c0_1 = arith.constant 0 : index
    %c0_2 = arith.constant 0 : index
    %1 = vector.load %arg2[%c0_1, %c0_2] : memref<256x128xf32, #tpu.memory_space<vmem>>, vector<256x128xf32>
    %cst = arith.constant dense<0.000000e+00> : vector<8x128xf32>
    %2 = tpu.matmul %0, %1, %cst {dimension_numbers = #tpu.dot_dimension_numbers<[1], [0], [0], [1], [0, 0, 1, 1], [], []>} : vector<8x256xf32>, vector<256x128xf32>, vector<8x128xf32> -> vector<8x128xf32>
    %c0_3 = arith.constant 0 : index
    %c0_4 = arith.constant 0 : index
    %3 = vector.load %arg3[%c0_3, %c0_4] : memref<1x128xf32, #tpu.memory_space<vmem>>, vector<1x128xf32>
    %4 = vector.broadcast %3 : vector<1x128xf32> to vector<8x128xf32>
    %5 = arith.subf %2, %4 : vector<8x128xf32>
    %6 = arith.mulf %5, %5 : vector<8x128xf32>
    %cst_5 = arith.constant dense<0.000000e+00> : vector<8xf32>
    %7 = vector.multi_reduction <add>, %6, %cst_5 [1] : vector<8x128xf32> to vector<8xf32>
    %8 = vector.shape_cast %7 : vector<8xf32> to vector<8x1xf32>
    %cst_6 = arith.constant 1.000000e-24 : f32
    %9 = vector.broadcast %cst_6 : f32 to vector<8x1xf32>
    %10 = arith.maximumf %8, %9 : vector<8x1xf32>
    %11 = math.rsqrt %10 : vector<8x1xf32>
    %12 = vector.broadcast %11 : vector<8x1xf32> to vector<8x128xf32>
    %13 = arith.mulf %5, %12 : vector<8x128xf32>
    %c0_7 = arith.constant 0 : index
    %c0_8 = arith.constant 0 : index
    %14 = vector.load %arg4[%c0_7, %c0_8] : memref<8x128xf32, #tpu.memory_space<vmem>>, vector<8x128xf32>
    tpu.vector_store %arg4[%c0_7, %c0_8], %13 {strides = array<i32>} : memref<8x128xf32, #tpu.memory_space<vmem>>, vector<8x128xf32>,
    return
  }
  func.func @transform_0(%arg0: i32) -> (i32, i32) {
    %c0_i32 = arith.constant 0 : i32
    %c0_i32_0 = arith.constant 0 : i32
    return %arg0, %c0_i32 : i32, i32
  }
  func.func @transform_1(%arg0: i32) -> (i32, i32) {
    %c0_i32 = arith.constant 0 : i32
    %c0_i32_0 = arith.constant 0 : i32
    %c0_i32_1 = arith.constant 0 : i32
    return %c0_i32, %c0_i32_0 : i32, i32
  }
  func.func @transform_2(%arg0: i32) -> (i32, i32) {
    %c0_i32 = arith.constant 0 : i32
    %c0_i32_0 = arith.constant 0 : i32
    %c0_i32_1 = arith.constant 0 : i32
    return %c0_i32, %c0_i32_0 : i32, i32
  }
  func.func @transform_3(%arg0: i32) -> (i32, i32) {
    %c0_i32 = arith.constant 0 : i32
    %c0_i32_0 = arith.constant 0 : i32
    return %arg0, %c0_i32 : i32, i32
  }
}

module attributes {stable_mosaic.version = 11 : i64} {
  func.func @linear_head_kernel(%arg0: i32, %arg1: memref<8x256xf32, #tpu.memory_space<vmem>>, %arg2: memref<256x128xf32, #tpu.memory_space<vmem>>, %arg3: memref<1x128xf32, #tpu.memory_space<vmem>>, %arg4: memref<8x128xf32, #tpu.memory_space<vmem>>) attributes {dimension_semantics = [#tpu.dimension_semantics<parallel>], iteration_bounds = array<i64: 1>, scalar_prefetch = 0 : i64, scratch_operands = 0 : i64, tpu.core_type = #tpu.core_type<tc>, window_params = [{transform_indices = @transform_0, window_bounds = array<i64: 8, 256>}, {pipeline_mode = #tpu.pipeline_mode<synchronous>, transform_indices = @transform_1, window_bounds = array<i64: 256, 128>}, {pipeline_mode = #tpu.pipeline_mode<synchronous>, transform_indices = @transform_2, window_bounds = array<i64: 1, 128>}, {transform_indices = @transform_3, window_bounds = array<i64: 8, 128>}]} {
    %c0 = arith.constant 0 : index
    %c0_0 = arith.constant 0 : index
    %0 = vector.load %arg1[%c0, %c0_0] : memref<8x256xf32, #tpu.memory_space<vmem>>, vector<8x256xf32>
    %c0_1 = arith.constant 0 : index
    %c0_2 = arith.constant 0 : index
    %1 = vector.load %arg2[%c0_1, %c0_2] : memref<256x128xf32, #tpu.memory_space<vmem>>, vector<256x128xf32>
    %cst = arith.constant dense<0.000000e+00> : vector<8x128xf32>
    %2 = tpu.matmul %0, %1, %cst {dimension_numbers = #tpu.dot_dimension_numbers<[1], [0], [0], [1], [0, 0, 1, 1], [], []>} : vector<8x256xf32>, vector<256x128xf32>, vector<8x128xf32> -> vector<8x128xf32>
    %c0_3 = arith.constant 0 : index
    %c0_4 = arith.constant 0 : index
    %3 = vector.load %arg3[%c0_3, %c0_4] : memref<1x128xf32, #tpu.memory_space<vmem>>, vector<1x128xf32>
    %4 = vector.broadcast %3 : vector<1x128xf32> to vector<8x128xf32>
    %5 = arith.subf %2, %4 : vector<8x128xf32>
    %6 = arith.mulf %5, %5 : vector<8x128xf32>
    %cst_5 = arith.constant dense<0.000000e+00> : vector<8xf32>
    %7 = vector.multi_reduction <add>, %6, %cst_5 [1] : vector<8x128xf32> to vector<8xf32>
    %8 = vector.shape_cast %7 : vector<8xf32> to vector<8x1xf32>
    %cst_6 = arith.constant 1.000000e-24 : f32
    %9 = vector.broadcast %cst_6 : f32 to vector<8x1xf32>
    %10 = arith.maximumf %8, %9 : vector<8x1xf32>
    %11 = math.rsqrt %10 : vector<8x1xf32>
    %12 = vector.broadcast %11 : vector<8x1xf32> to vector<8x128xf32>
    %13 = arith.mulf %5, %12 : vector<8x128xf32>
    %c0_7 = arith.constant 0 : index
    %c0_8 = arith.constant 0 : index
    %14 = vector.load %arg4[%c0_7, %c0_8] : memref<8x128xf32, #tpu.memory_space<vmem>>, vector<8x128xf32>
    tpu.vector_store %arg4[%c0_7, %c0_8], %13 {strides = array<i32>} : memref<8x128xf32, #tpu.memory_space<vmem>>, vector<8x128xf32>,
    return
  }
  func.func @transform_0(%arg0: i32) -> (i32, i32) {
    %c0_i32 = arith.constant 0 : i32
    %c0_i32_0 = arith.constant 0 : i32
    return %arg0, %c0_i32 : i32, i32
  }
  func.func @transform_1(%arg0: i32) -> (i32, i32) {
    %c0_i32 = arith.constant 0 : i32
    %c0_i32_0 = arith.constant 0 : i32
    %c0_i32_1 = arith.constant 0 : i32
    return %c0_i32, %c0_i32_0 : i32, i32
  }
  func.func @transform_2(%arg0: i32) -> (i32, i32) {
    %c0_i32 = arith.constant 0 : i32
    %c0_i32_0 = arith.constant 0 : i32
    %c0_i32_1 = arith.constant 0 : i32
    return %c0_i32, %c0_i32_0 : i32, i32
  }
  func.func @transform_3(%arg0: i32) -> (i32, i32) {
    %c0_i32 = arith.constant 0 : i32
    %c0_i32_0 = arith.constant 0 : i32
    return %arg0, %c0_i32 : i32, i32
  }
}

</mosaic_0001>

<bundles_post_ra>
// kernel: tpu_custom_call.1
= control target key start
LH: loop header
LB: loop body
LE: loop exit
PB: predicated region body
PF: predicated region fallthrough
CT: control target
= control target key end

     0   :  { %8 = vsyncpa [#allocation3], 0  ;;  %s322_s0 = inlined_call_operand.hbm [shape: f32[8,256], index: 0, kind: input, shape index: {}]   ;;  %s323_s1 = inlined_call_operand.hbm [shape: f32[256,128], index: 1, kind: input, shape index: {}]   ;;  %s324_s2 = inlined_call_operand.vmem [shape: f32[1,128], index: 2, kind: input, shape index: {}]   ;;  %s325_s3 = inlined_call_operand.hbm [shape: f32[8,128], index: 3, kind: output, shape index: {}]  }
   0x1   :  { %9 = vsyncpa [#allocation6], 0 }
   0x2   :  { %10 = vsyncpa [#allocation4], 0  ;;  %s285_s12 = smov [#allocation2]   ;;  %s286_s14 = smov [#allocation5]  }
   0x3   :  { %s17_s13 = sshll.u32 %s285_s12, 4  ;;  %s26_s15 = sshll.u32 %s286_s14, 4  ;;  %s18_s13 = int_to_ptr.vmem [resolvable:$true] %s17_s13  ;;  %s27_s15 = int_to_ptr.vmem [resolvable:$true] %s26_s15 }
   0x4   :  { %s227_s16 = scalar_lea.vmem %s18_s13, 256  ;;  %p232_p1 = scmp.lt.s32.totalorder %s18_s13, %s18_s13 }
   0x5   :  { %p228_p0 = scmp.ne.s32.totalorder %s18_s13, %s227_s16  ;;  %p233_p2 = scmp.lt.s32.totalorder %s227_s16, %s227_s16 }
   0x7   :  { %p234_p3 = por %p233_p2, %p232_p1 }
   0x9   :  { %p235_p4 = pnand %p234_p3, %p228_p0 }
   0xb   :  { %238 = shalt.err (!%p235_p4)
}
   0xc   :  { %20 = dma.hbm_to_vmem [thread:$0]  %s322_s0, 256, %s18_s13, [#allocation3]  }
   0xd   :  { %s247_s19 = scalar_lea.vmem %s27_s15, 4096  ;;  %p252_p6 = scmp.lt.s32.totalorder %s27_s15, %s27_s15 }
   0xe   :  { %p248_p5 = scmp.ne.s32.totalorder %s27_s15, %s247_s19  ;;  %p253_p7 = scmp.lt.s32.totalorder %s247_s19, %s247_s19 }
  0x10   :  { %p254_p8 = por %p253_p7, %p252_p6 }
  0x12   :  { %p255_p9 = pnand %p254_p8, %p248_p5 }
  0x14   :  { %258 = shalt.err (!%p255_p9)
}
  0x15   :  { %s287_s20 = smov 128   ;;  %s288_s21 = smov 8  }
  0x16   :  { %32 = dma.hbm_to_vmem [thread:$0]  %s323_s1, 4096, %s27_s15, [#allocation6], %s287_s20, %s287_s20, %s288_s21  }
  0x17   :  { %279 = dma.done.wait [#allocation3], 256  }
  0x18   :  { %280 = vsyncadd [#allocation3], 4294967040 }
  0x19   :  { %281 = dma.done.wait [#allocation6], 4096  }
  0x1a   :  { %282 = vsyncadd [#allocation6], 4294963200  ;;  %v74_v0 = vld [vmem:[#allocation5 + $0xf8] sm:$0xff]  ;;  %v73_v2 = vld [vmem:[#allocation5 + $0xf0] sm:$0xff]  ;;  %s289_s24 = smov [#allocation7]  }
  0x1b   :  { %v58_v1 = vld [vmem:[#allocation5 + $0x78] sm:$0xff]  ;;  %177 = vmatprep.subr.mxu0 %v74_v0  ;;  %v57_v3 = vld [vmem:[#allocation5 + $0x70] sm:$0xff]  ;;  %v72_v4 = vld [vmem:[#allocation5 + $0xe8] sm:$0xff]  ;;  %s166_s25 = sshll.u32 %s289_s24, 4  ;;  %s167_s25 = int_to_ptr.vmem [resolvable:$true] %s166_s25 }
  0x1c   :  { %178 = vmatpush3.msra.mxu0 %v58_v1  ;;  %v56_v5 = vld [vmem:[#allocation5 + $0x68] sm:$0xff]  ;;  %v71_v6 = vld [vmem:[#allocation5 + $0xe0] sm:$0xff]  ;;  %v70_v8 = vld [vmem:[#allocation5 + $0xd8] sm:$0xff]  ;;  %s259_s26 = scalar_lea.vmem %s167_s25, 128  ;;  %p264_p11 = scmp.lt.s32.totalorder %s167_s25, %s167_s25 }
  0x1d   :  { %179 = vmatprep.subr.mxu0 %v73_v2  ;;  %v55_v7 = vld [vmem:[#allocation5 + $0x60] sm:$0xff]  ;;  %v54_v9 = vld [vmem:[#allocation5 + $0x58] sm:$0xff]  ;;  %v69_v10 = vld [vmem:[#allocation5 + $0xd0] sm:$0xff]  ;;  %p260_p10 = scmp.ne.s32.totalorder %s167_s25, %s259_s26  ;;  %p265_p12 = scmp.lt.s32.totalorder %s259_s26, %s259_s26 }
  0x1e   :  { %180 = vmatpush3.msra.mxu0 %v57_v3  ;;  %v53_v11 = vld [vmem:[#allocation5 + $0x50] sm:$0xff]  ;;  %v68_v12 = vld [vmem:[#allocation5 + $0xc8] sm:$0xff]  ;;  %v42_v13 = vld [vmem:[#allocation2 + $0x8] sm:$0xff] }
  0x1f   :  { %181 = vmatprep.subr.mxu0 %v72_v4  ;;  %v52_v14 = vld [vmem:[#allocation5 + $0x48] sm:$0xff]  ;;  %139 = vmatprep.mubr.f32.mxu0 %v42_v13  ;;  %v67_v15 = vld [vmem:[#allocation5 + $0xc0] sm:$0xff]  ;;  %v66_v17 = vld [vmem:[#allocation5 + $0xb8] sm:$0xff]  ;;  %p266_p13 = por %p265_p12, %p264_p11 }
  0x20   :  { %182 = vmatpush3.msra.mxu0 %v56_v5  ;;  %v51_v16 = vld [vmem:[#allocation5 + $0x40] sm:$0xff]  ;;  %v50_v18 = vld [vmem:[#allocation5 + $0x38] sm:$0xff]  ;;  %v65_v19 = vld [vmem:[#allocation5 + $0xb0] sm:$0xff] }
  0x21   :  { %183 = vmatprep.subr.mxu0 %v71_v6  ;;  %v49_v20 = vld [vmem:[#allocation5 + $0x30] sm:$0xff]  ;;  %v64_v21 = vld [vmem:[#allocation5 + $0xa8] sm:$0xff]  ;;  %v63_v23 = vld [vmem:[#allocation5 + $0xa0] sm:$0xff]  ;;  %p267_p0 = pnand %p266_p13, %p260_p10 }
  0x22   :  { %184 = vmatpush3.msra.mxu0 %v55_v7  ;;  %v48_v22 = vld [vmem:[#allocation5 + $0x28] sm:$0xff]  ;;  %v47_v24 = vld [vmem:[#allocation5 + $0x20] sm:$0xff]  ;;  %v62_v25 = vld [vmem:[#allocation5 + $0x98] sm:$0xff] }
  0x23   :  { %185 = vmatprep.subr.mxu0 %v70_v8  ;;  %v46_v26 = vld [vmem:[#allocation5 + $0x18] sm:$0xff]  ;;  %v61_v27 = vld [vmem:[#allocation5 + $0x90] sm:$0xff]  ;;  %v60_v29 = vld [vmem:[#allocation5 + $0x88] sm:$0xff] }
  0x24   :  { %186 = vmatpush3.msra.mxu0 %v54_v9  ;;  %v45_v28 = vld [vmem:[#allocation5 + $0x10] sm:$0xff]  ;;  %v44_v30 = vld [vmem:[#allocation5 + $0x8] sm:$0xff]  ;;  %v59_v31 = vld [vmem:[#allocation5 + $0x80] sm:$0xff] }
  0x25   :  { %187 = vmatprep.subr.mxu0 %v69_v10  ;;  %v43_v32 = vld [vmem:[#allocation5] sm:$0xff]  ;;  %v41_v33 = vld [vmem:[#allocation2] sm:$0xff] }
  0x26   :  { %188 = vmatpush3.msra.mxu0 %v53_v11  ;;  %v176_v36 = vld [vmem:[%s324_s2] ss:$0 sm:$0xff] }
  0x27   :  { %189 = vmatprep.subr.mxu0 %v68_v12 }
  0x28   :  { %190 = vmatpush3.msra.mxu0 %v52_v14 }
  0x29   :  { %191 = vmatprep.subr.mxu0 %v67_v15 }
  0x2a   :  { %192 = vmatpush3.msra.mxu0 %v51_v16 }
  0x2b   :  { %193 = vmatprep.subr.mxu0 %v66_v17 }
  0x2c   :  { %194 = vmatpush3.msra.mxu0 %v50_v18 }
  0x2d   :  { %195 = vmatprep.subr.mxu0 %v65_v19 }
  0x2e   :  { %196 = vmatpush3.msra.mxu0 %v49_v20 }
  0x2f   :  { %197 = vmatprep.subr.mxu0 %v64_v21 }
  0x30   :  { %198 = vmatpush3.msra.mxu0 %v48_v22 }
  0x31   :  { %199 = vmatprep.subr.mxu0 %v63_v23 }
  0x32   :  { %200 = vmatpush3.msra.mxu0 %v47_v24 }
  0x33   :  { %201 = vmatprep.subr.mxu0 %v62_v25 }
  0x34   :  { %202 = vmatpush3.msra.mxu0 %v46_v26 }
  0x35   :  { %203 = vmatprep.subr.mxu0 %v61_v27 }
  0x36   :  { %204 = vmatpush3.msra.mxu0 %v45_v28 }
  0x37   :  { %205 = vmatprep.subr.mxu0 %v60_v29 }
  0x38   :  { %206 = vmatpush3.msra.mxu0 %v44_v30 }
  0x39   :  { %207 = vmatprep.subr.mxu0 %v59_v31 }
  0x3a   :  { %208 = vmatpush3.msra.mxu0 %v43_v32 }
  0x3b   :  { %140 = vmatmul.mubr.f32.vlgmr.msra.gmra.mxu0 %v41_v33 }
  0xfb   :  { %v209_v34 = vpop.f32.mrf.mxu0 }
  0xfd   :  { %v210_v35 = vpop.f32.mrf.mxu0 }
  0xfe   :  { %v211_v37 = vadd.f32 %v210_v35, %v209_v34 }
 0x100   :  { %v152_v38 = vsub.f32 %v211_v37, %v176_v36 }
 0x102   :  { %v153_v39 = vmul.f32 %v152_v38, %v152_v38 }
 0x104   :  { %154 = vadd.xlane.f32.xlu0 %v153_v39 }
 0x18d   :  { %v155_v40 = vpop.xlane.xlu0 %154 }
 0x18e   :  { %v156_v41 = vmax.f32 %v155_v40, 1e-24 }
 0x190   :  { %217 = vrsqrt.f32 %v156_v41 }
 0x19d   :  { %v218_v42 = vpop.eup %217 }
 0x19e   :  { %v158_v43 = vmul.f32 %v218_v42, %v152_v38 }
 0x1a0   :  { %159 = vst [vmem:[#allocation7] sm:$0xff] %v158_v43 }
 0x1a1   :  { %270 = shalt.err (!%p267_p0)
}
 0x1a2   :  { %169 = dma.vmem_to_hbm [thread:$0]  %s167_s25, 128, %s325_s3, [#allocation4]  }
 0x1a3   :  { %283 = dma.done.wait [#allocation4], 128  }
 0x1a4   :  { %284 = vsyncadd [#allocation4], 4294967168 }
 0x1a5   :  { %173 = vsyncpa [#allocation3], 1 }
 0x1a6   :  { %174 = vsyncpa [#allocation6], 1 }
 0x1a7   :  { %175 = vsyncpa [#allocation4], 1 }

// kernel: tpu_custom_call.1
= control target key start
LH: loop header
LB: loop body
LE: loop exit
PB: predicated region body
PF: predicated region fallthrough
CT: control target
= control target key end

     0   :  { %8 = vsyncpa [#allocation3], 0  ;;  %s322_s0 = inlined_call_operand.hbm [shape: f32[8,256], index: 0, kind: input, shape index: {}]   ;;  %s323_s1 = inlined_call_operand.hbm [shape: f32[256,128], index: 1, kind: input, shape index: {}]   ;;  %s324_s2 = inlined_call_operand.vmem [shape: f32[1,128], index: 2, kind: input, shape index: {}]   ;;  %s325_s3 = inlined_call_operand.hbm [shape: f32[8,128], index: 3, kind: output, shape index: {}]  }
   0x1   :  { %9 = vsyncpa [#allocation6], 0 }
   0x2   :  { %10 = vsyncpa [#allocation4], 0  ;;  %s285_s12 = smov [#allocation2]   ;;  %s286_s14 = smov [#allocation5]  }
   0x3   :  { %s17_s13 = sshll.u32 %s285_s12, 4  ;;  %s26_s15 = sshll.u32 %s286_s14, 4  ;;  %s18_s13 = int_to_ptr.vmem [resolvable:$true] %s17_s13  ;;  %s27_s15 = int_to_ptr.vmem [resolvable:$true] %s26_s15 }
   0x4   :  { %s227_s16 = scalar_lea.vmem %s18_s13, 256  ;;  %p232_p1 = scmp.lt.s32.totalorder %s18_s13, %s18_s13 }
   0x5   :  { %p228_p0 = scmp.ne.s32.totalorder %s18_s13, %s227_s16  ;;  %p233_p2 = scmp.lt.s32.totalorder %s227_s16, %s227_s16 }
   0x7   :  { %p234_p3 = por %p233_p2, %p232_p1 }
   0x9   :  { %p235_p4 = pnand %p234_p3, %p228_p0 }
   0xb   :  { %238 = shalt.err (!%p235_p4)
}
   0xc   :  { %20 = dma.hbm_to_vmem [thread:$0]  %s322_s0, 256, %s18_s13, [#allocation3]  }
   0xd   :  { %s247_s19 = scalar_lea.vmem %s27_s15, 4096  ;;  %p252_p6 = scmp.lt.s32.totalorder %s27_s15, %s27_s15 }
   0xe   :  { %p248_p5 = scmp.ne.s32.totalorder %s27_s15, %s247_s19  ;;  %p253_p7 = scmp.lt.s32.totalorder %s247_s19, %s247_s19 }
  0x10   :  { %p254_p8 = por %p253_p7, %p252_p6 }
  0x12   :  { %p255_p9 = pnand %p254_p8, %p248_p5 }
  0x14   :  { %258 = shalt.err (!%p255_p9)
}
  0x15   :  { %s287_s20 = smov 128   ;;  %s288_s21 = smov 8  }
  0x16   :  { %32 = dma.hbm_to_vmem [thread:$0]  %s323_s1, 4096, %s27_s15, [#allocation6], %s287_s20, %s287_s20, %s288_s21  }
  0x17   :  { %279 = dma.done.wait [#allocation3], 256  }
  0x18   :  { %280 = vsyncadd [#allocation3], 4294967040 }
  0x19   :  { %281 = dma.done.wait [#allocation6], 4096  }
  0x1a   :  { %282 = vsyncadd [#allocation6], 4294963200  ;;  %v74_v0 = vld [vmem:[#allocation5 + $0xf8] sm:$0xff]  ;;  %v73_v2 = vld [vmem:[#allocation5 + $0xf0] sm:$0xff]  ;;  %s289_s24 = smov [#allocation7]  }
  0x1b   :  { %v58_v1 = vld [vmem:[#allocation5 + $0x78] sm:$0xff]  ;;  %177 = vmatprep.subr.mxu0 %v74_v0  ;;  %v57_v3 = vld [vmem:[#allocation5 + $0x70] sm:$0xff]  ;;  %v72_v4 = vld [vmem:[#allocation5 + $0xe8] sm:$0xff]  ;;  %s166_s25 = sshll.u32 %s289_s24, 4  ;;  %s167_s25 = int_to_ptr.vmem [resolvable:$true] %s166_s25 }
  0x1c   :  { %178 = vmatpush3.msra.mxu0 %v58_v1  ;;  %v56_v5 = vld [vmem:[#allocation5 + $0x68] sm:$0xff]  ;;  %v71_v6 = vld [vmem:[#allocation5 + $0xe0] sm:$0xff]  ;;  %v70_v8 = vld [vmem:[#allocation5 + $0xd8] sm:$0xff]  ;;  %s259_s26 = scalar_lea.vmem %s167_s25, 128  ;;  %p264_p11 = scmp.lt.s32.totalorder %s167_s25, %s167_s25 }
  0x1d   :  { %179 = vmatprep.subr.mxu0 %v73_v2  ;;  %v55_v7 = vld [vmem:[#allocation5 + $0x60] sm:$0xff]  ;;  %v54_v9 = vld [vmem:[#allocation5 + $0x58] sm:$0xff]  ;;  %v69_v10 = vld [vmem:[#allocation5 + $0xd0] sm:$0xff]  ;;  %p260_p10 = scmp.ne.s32.totalorder %s167_s25, %s259_s26  ;;  %p265_p12 = scmp.lt.s32.totalorder %s259_s26, %s259_s26 }
  0x1e   :  { %180 = vmatpush3.msra.mxu0 %v57_v3  ;;  %v53_v11 = vld [vmem:[#allocation5 + $0x50] sm:$0xff]  ;;  %v68_v12 = vld [vmem:[#allocation5 + $0xc8] sm:$0xff]  ;;  %v42_v13 = vld [vmem:[#allocation2 + $0x8] sm:$0xff] }
  0x1f   :  { %181 = vmatprep.subr.mxu0 %v72_v4  ;;  %v52_v14 = vld [vmem:[#allocation5 + $0x48] sm:$0xff]  ;;  %139 = vmatprep.mubr.f32.mxu0 %v42_v13  ;;  %v67_v15 = vld [vmem:[#allocation5 + $0xc0] sm:$0xff]  ;;  %v66_v17 = vld [vmem:[#allocation5 + $0xb8] sm:$0xff]  ;;  %p266_p13 = por %p265_p12, %p264_p11 }
  0x20   :  { %182 = vmatpush3.msra.mxu0 %v56_v5  ;;  %v51_v16 = vld [vmem:[#allocation5 + $0x40] sm:$0xff]  ;;  %v50_v18 = vld [vmem:[#allocation5 + $0x38] sm:$0xff]  ;;  %v65_v19 = vld [vmem:[#allocation5 + $0xb0] sm:$0xff] }
  0x21   :  { %183 = vmatprep.subr.mxu0 %v71_v6  ;;  %v49_v20 = vld [vmem:[#allocation5 + $0x30] sm:$0xff]  ;;  %v64_v21 = vld [vmem:[#allocation5 + $0xa8] sm:$0xff]  ;;  %v63_v23 = vld [vmem:[#allocation5 + $0xa0] sm:$0xff]  ;;  %p267_p0 = pnand %p266_p13, %p260_p10 }
  0x22   :  { %184 = vmatpush3.msra.mxu0 %v55_v7  ;;  %v48_v22 = vld [vmem:[#allocation5 + $0x28] sm:$0xff]  ;;  %v47_v24 = vld [vmem:[#allocation5 + $0x20] sm:$0xff]  ;;  %v62_v25 = vld [vmem:[#allocation5 + $0x98] sm:$0xff] }
  0x23   :  { %185 = vmatprep.subr.mxu0 %v70_v8  ;;  %v46_v26 = vld [vmem:[#allocation5 + $0x18] sm:$0xff]  ;;  %v61_v27 = vld [vmem:[#allocation5 + $0x90] sm:$0xff]  ;;  %v60_v29 = vld [vmem:[#allocation5 + $0x88] sm:$0xff] }
  0x24   :  { %186 = vmatpush3.msra.mxu0 %v54_v9  ;;  %v45_v28 = vld [vmem:[#allocation5 + $0x10] sm:$0xff]  ;;  %v44_v30 = vld [vmem:[#allocation5 + $0x8] sm:$0xff]  ;;  %v59_v31 = vld [vmem:[#allocation5 + $0x80] sm:$0xff] }
  0x25   :  { %187 = vmatprep.subr.mxu0 %v69_v10  ;;  %v43_v32 = vld [vmem:[#allocation5] sm:$0xff]  ;;  %v41_v33 = vld [vmem:[#allocation2] sm:$0xff] }
  0x26   :  { %188 = vmatpush3.msra.mxu0 %v53_v11  ;;  %v176_v36 = vld [vmem:[%s324_s2] ss:$0 sm:$0xff] }
  0x27   :  { %189 = vmatprep.subr.mxu0 %v68_v12 }
  0x28   :  { %190 = vmatpush3.msra.mxu0 %v52_v14 }
  0x29   :  { %191 = vmatprep.subr.mxu0 %v67_v15 }
  0x2a   :  { %192 = vmatpush3.msra.mxu0 %v51_v16 }
  0x2b   :  { %193 = vmatprep.subr.mxu0 %v66_v17 }
  0x2c   :  { %194 = vmatpush3.msra.mxu0 %v50_v18 }
  0x2d   :  { %195 = vmatprep.subr.mxu0 %v65_v19 }
  0x2e   :  { %196 = vmatpush3.msra.mxu0 %v49_v20 }
  0x2f   :  { %197 = vmatprep.subr.mxu0 %v64_v21 }
  0x30   :  { %198 = vmatpush3.msra.mxu0 %v48_v22 }
  0x31   :  { %199 = vmatprep.subr.mxu0 %v63_v23 }
  0x32   :  { %200 = vmatpush3.msra.mxu0 %v47_v24 }
  0x33   :  { %201 = vmatprep.subr.mxu0 %v62_v25 }
  0x34   :  { %202 = vmatpush3.msra.mxu0 %v46_v26 }
  0x35   :  { %203 = vmatprep.subr.mxu0 %v61_v27 }
  0x36   :  { %204 = vmatpush3.msra.mxu0 %v45_v28 }
  0x37   :  { %205 = vmatprep.subr.mxu0 %v60_v29 }
  0x38   :  { %206 = vmatpush3.msra.mxu0 %v44_v30 }
  0x39   :  { %207 = vmatprep.subr.mxu0 %v59_v31 }
  0x3a   :  { %208 = vmatpush3.msra.mxu0 %v43_v32 }
  0x3b   :  { %140 = vmatmul.mubr.f32.vlgmr.msra.gmra.mxu0 %v41_v33 }
  0xfb   :  { %v209_v34 = vpop.f32.mrf.mxu0 }
  0xfd   :  { %v210_v35 = vpop.f32.mrf.mxu0 }
  0xfe   :  { %v211_v37 = vadd.f32 %v210_v35, %v209_v34 }
 0x100   :  { %v152_v38 = vsub.f32 %v211_v37, %v176_v36 }
 0x102   :  { %v153_v39 = vmul.f32 %v152_v38, %v152_v38 }
 0x104   :  { %154 = vadd.xlane.f32.xlu0 %v153_v39 }
 0x18d   :  { %v155_v40 = vpop.xlane.xlu0 %154 }
 0x18e   :  { %v156_v41 = vmax.f32 %v155_v40, 1e-24 }
 0x190   :  { %217 = vrsqrt.f32 %v156_v41 }
 0x19d   :  { %v218_v42 = vpop.eup %217 }
 0x19e   :  { %v158_v43 = vmul.f32 %v218_v42, %v152_v38 }
 0x1a0   :  { %159 = vst [vmem:[#allocation7] sm:$0xff] %v158_v43 }
 0x1a1   :  { %270 = shalt.err (!%p267_p0)
}
 0x1a2   :  { %169 = dma.vmem_to_hbm [thread:$0]  %s167_s25, 128, %s325_s3, [#allocation4]  }
 0x1a3   :  { %283 = dma.done.wait [#allocation4], 128  }
 0x1a4   :  { %284 = vsyncadd [#allocation4], 4294967168 }
 0x1a5   :  { %173 = vsyncpa [#allocation3], 1 }
 0x1a6   :  { %174 = vsyncpa [#allocation6], 1 }
 0x1a7   :  { %175 = vsyncpa [#allocation4], 1 }

</bundles_post_ra>
